<compile_context>
chip_gen: v7x
topology: tpu7x:2x2x1
jax: 0.10.0
libtpu: 0.0.40
codegen_flags: <defaults>
</compile_context>

<pallas_src>
import functools

import jax
import jax.numpy as jnp
from jax import lax
from jax.experimental import pallas as pl
from jax.experimental.pallas import tpu as pltpu


def conv_bn_silu_kernel(x_ref, w_ref, b_ref, o_ref, pad_ref, col_ref, *, W):
    """One batch element: 3x3 'SAME' conv (single matmul) + bias + SiLU.

    x_ref:   (Cin, H*W)          f32  input, spatial flattened (lane-dense)
    w_ref:   (Cout, 9*Cin)       bf16 BN-scale-folded weight, col = tap*Cin + ci
    b_ref:   (Cout, 1)           f32  folded conv-bias + BN bias
    o_ref:   (Cout, H*W)         f32  output (lane-dense; reshaped to NCHW outside)
    pad_ref: (Cin, P + H*W + P)  f32  scratch: flat zero-padded copy of x
    col_ref: (9*Cin, H*W)        f32  scratch: im2col matrix
    """
    Cin, HW = x_ref.shape
    P = (pad_ref.shape[1] - HW) // 2      # halo per side (>= W+1, lane-aligned)

    # In-kernel zero padding (replaces a wrapper-side jnp.pad HBM round trip).
    # A row-major flat halo of >= W+1 zeros on each side absorbs the vertical
    # (dy = +/-1) over/under-runs of every 3x3 tap.  Only the halos need
    # zeroing; the center window is fully overwritten.
    pad_ref[:, :P] = jnp.zeros((Cin, P), pad_ref.dtype)
    pad_ref[:, P + HW:] = jnp.zeros((Cin, P), pad_ref.dtype)
    pad_ref[:, P:P + HW] = x_ref[...]

    # Column index of every flattened pixel; masks the horizontal wrap of the
    # dx = +/-1 taps (vertical overflow already lands in the zero halo).
    # Hoisted: computed once, reused by all 6 shifted taps.
    col_idx = lax.broadcasted_iota(jnp.int32, (Cin, HW), 1) % W
    mask_left = col_idx >= 1           # valid lanes for dx = -1 taps
    mask_right = col_idx < W - 1       # valid lanes for dx = +1 taps

    # im2col: each tap is a static lane-offset slice (shift = dy*W + dx) of the
    # padded buffer -- no reshape/transpose relayouts; one masked select for
    # each of the 6 horizontally shifted taps.
    t = 0
    for dy in (-1, 0, 1):
        for dx in (-1, 0, 1):
            s = dy * W + dx
            v = pad_ref[:, P + s:P + s + HW]
            if dx == 1:
                v = jnp.where(mask_right, v, 0.0)
            elif dx == -1:
                v = jnp.where(mask_left, v, 0.0)
            col_ref[t * Cin:(t + 1) * Cin, :] = v
            t += 1

    # Single MXU contraction: (Cout, 9*Cin) @ (9*Cin, H*W), bf16 operands,
    # f32 accumulation. Output lanes = H*W -> unmasked, lane-dense stores.
    acc = jnp.dot(w_ref[...], col_ref[...].astype(jnp.bfloat16),
                  preferred_element_type=jnp.float32)

    y = acc + b_ref[...]                  # conv bias + BN (scale already in weight)
    y = y * jax.nn.sigmoid(y)             # SiLU (sigmoid on the EUP path)
    o_ref[...] = y.astype(o_ref.dtype)


@jax.jit
def extra_conv_block_forward(x_nchw, w_oihw, bn_scale, bn_bias):
    """x_nchw: (N, Cin, H, W) f32 -> (N, Cout, H, W) f32  (Conv3x3 + BN + SiLU)."""
    N, Cin, H, W = x_nchw.shape
    Cout = w_oihw.shape[0]
    HW = H * W
    P = ((W + 1 + 127) // 128) * 128      # lane-aligned halo, >= W+1

    # Fold BN scale into the conv weight (per output channel) and reshape it to
    # the (Cout, 9*Cin) matmul matrix with column order (dy, dx, cin); bf16 for MXU.
    w_mat = w_oihw * bn_scale[:, None, None, None]                  # (Cout,Cin,3,3)
    w_mat = jnp.transpose(w_mat, (0, 2, 3, 1)).reshape(Cout, 9 * Cin)
    w_mat = w_mat.astype(jnp.bfloat16)
    bias = bn_bias.reshape(Cout, 1).astype(jnp.float32)

    # Free reshape (contiguous dims): spatial -> lane axis, stays NCHW-ordered.
    x_flat = x_nchw.reshape(N, Cin, HW)

    kernel = functools.partial(conv_bn_silu_kernel, W=W)

    # TODO(synk): for large H*W / channel counts, add spatial (row-block + halo)
    # and Cout tiling with a multi-axis parallel grid (v7x: 2 TCs, 64 MiB VMEM;
    # v6e: 256-aligned MXU tiles). The toy shapes here fit one tile per image.
    out_flat = pl.pallas_call(
        kernel,
        out_shape=jax.ShapeDtypeStruct((N, Cout, HW), jnp.float32),
        grid_spec=pltpu.PrefetchScalarGridSpec(
            num_scalar_prefetch=0,
            grid=(N,),
            in_specs=[
                pl.BlockSpec((None, Cin, HW), lambda b: (b, 0, 0)),
                pl.BlockSpec((Cout, 9 * Cin), lambda b: (0, 0)),   # resident weight
                pl.BlockSpec((Cout, 1), lambda b: (0, 0)),         # resident bias
            ],
            out_specs=pl.BlockSpec((None, Cout, HW), lambda b: (b, 0, 0)),
            scratch_shapes=[
                pltpu.VMEM((Cin, P + HW + P), jnp.float32),   # padded input
                pltpu.VMEM((9 * Cin, HW), jnp.float32),       # im2col matrix
            ],
        ),
        compiler_params=pltpu.CompilerParams(
            dimension_semantics=("parallel",)),
    )(x_flat, w_mat, bias)

    return out_flat.reshape(N, Cout, H, W)


def reference_forward(x_nchw, w_oihw, bn_scale, bn_bias):
    """Matched-precision JAX reference (bf16 operands, f32 accumulation)."""
    w_folded = (w_oihw * bn_scale[:, None, None, None]).astype(jnp.bfloat16)
    y = lax.conv_general_dilated(
        x_nchw.astype(jnp.bfloat16), w_folded,
        window_strides=(1, 1), padding="SAME",
        dimension_numbers=("NCHW", "OIHW", "NCHW"),
        preferred_element_type=jnp.float32)
    y = y + bn_bias[None, :, None, None]
    return y * jax.nn.sigmoid(y)


if __name__ == "__main__":
    key = jax.random.PRNGKey(0)
    k_x, k_w, k_b, k_g, k_be, k_m, k_v = jax.random.split(key, 7)

    N, Cin, H, W = 2, 4, 16, 16
    Cout = 8
    eps = 1e-5

    x = jax.random.normal(k_x, (N, Cin, H, W), jnp.float32)

    # Deterministic synthetic parameters (PyTorch-layout conv weight + BN, eval mode).
    w_oihw = 0.1 * jax.random.normal(k_w, (Cout, Cin, 3, 3), jnp.float32)
    conv_b = 0.1 * jax.random.normal(k_b, (Cout,), jnp.float32)
    gamma = 1.0 + 0.1 * jax.random.normal(k_g, (Cout,), jnp.float32)
    beta = 0.1 * jax.random.normal(k_be, (Cout,), jnp.float32)
    run_mean = 0.1 * jax.random.normal(k_m, (Cout,), jnp.float32)
    run_var = jnp.abs(1.0 + 0.1 * jax.random.normal(k_v, (Cout,), jnp.float32))

    # Fold conv bias + BatchNorm (inference) into per-channel scale/bias.
    bn_scale = gamma / jnp.sqrt(run_var + eps)
    bn_bias = (conv_b - run_mean) * bn_scale + beta

    out = jax.block_until_ready(extra_conv_block_forward(x, w_oihw, bn_scale, bn_bias))
    ref = reference_forward(x, w_oihw, bn_scale, bn_bias)

    assert out.shape == (N, Cout, H, W)
    assert jnp.allclose(out, ref, atol=1e-3, rtol=1e-3), "mismatch vs reference"

    print("KERNEL_OK")
</pallas_src>

<mosaic_0001>
module attributes {stable_mosaic.version = 11 : i64} {
  func.func @conv_bn_silu_kernel(%arg0: i32, %arg1: memref<1x4x256xf32, #tpu.memory_space<vmem>>, %arg2: memref<8x36xbf16, #tpu.memory_space<vmem>>, %arg3: memref<8x1xf32, #tpu.memory_space<vmem>>, %arg4: memref<1x8x256xf32, #tpu.memory_space<vmem>>, %arg5: memref<4x512xf32, #tpu.memory_space<vmem>>, %arg6: memref<36x256xf32, #tpu.memory_space<vmem>>) attributes {dimension_semantics = [#tpu.dimension_semantics<parallel>], iteration_bounds = array<i64: 2>, scalar_prefetch = 0 : i64, scratch_operands = 2 : i64, tpu.core_type = #tpu.core_type<tc>, window_params = [{transform_indices = @transform_0, window_bounds = array<i64: 1, 4, 256>}, {pipeline_mode = #tpu.pipeline_mode<synchronous>, transform_indices = @transform_1, window_bounds = array<i64: 8, 36>}, {pipeline_mode = #tpu.pipeline_mode<synchronous>, transform_indices = @transform_2, window_bounds = array<i64: 8, 1>}, {transform_indices = @transform_3, window_bounds = array<i64: 1, 8, 256>}]} {
    %cst = arith.constant 0.000000e+00 : f32
    %0 = vector.broadcast %cst : f32 to vector<4x128xf32>
    %c0 = arith.constant 0 : index
    %c0_0 = arith.constant 0 : index
    %1 = vector.load %arg5[%c0, %c0_0] : memref<4x512xf32, #tpu.memory_space<vmem>>, vector<4x128xf32>
    tpu.vector_store %arg5[%c0, %c0_0], %0 {strides = array<i32>} : memref<4x512xf32, #tpu.memory_space<vmem>>, vector<4x128xf32>,
    %cst_1 = arith.constant 0.000000e+00 : f32
    %2 = vector.broadcast %cst_1 : f32 to vector<4x128xf32>
    %c0_2 = arith.constant 0 : index
    %c384 = arith.constant 384 : index
    %3 = vector.load %arg5[%c0_2, %c384] : memref<4x512xf32, #tpu.memory_space<vmem>>, vector<4x128xf32>
    tpu.vector_store %arg5[%c0_2, %c384], %2 {strides = array<i32>} : memref<4x512xf32, #tpu.memory_space<vmem>>, vector<4x128xf32>,
    %c0_3 = arith.constant 0 : index
    %c0_4 = arith.constant 0 : index
    %c0_5 = arith.constant 0 : index
    %4 = vector.load %arg1[%c0_3, %c0_4, %c0_5] : memref<1x4x256xf32, #tpu.memory_space<vmem>>, vector<1x4x256xf32>
    %5 = vector.shape_cast %4 : vector<1x4x256xf32> to vector<4x256xf32>
    %c0_6 = arith.constant 0 : index
    %c128 = arith.constant 128 : index
    %6 = vector.load %arg5[%c0_6, %c128] : memref<4x512xf32, #tpu.memory_space<vmem>>, vector<4x256xf32>
    tpu.vector_store %arg5[%c0_6, %c128], %5 {strides = array<i32>} : memref<4x512xf32, #tpu.memory_space<vmem>>, vector<4x256xf32>,
    %7 = tpu.iota {dimensions = array<i32: 1>} : vector<4x256xi32>
    %c16_i32 = arith.constant 16 : i32
    %c0_i32 = arith.constant 0 : i32
    %8 = arith.cmpi eq, %c16_i32, %c0_i32 : i32
    %c1_i32 = arith.constant 1 : i32
    %9 = arith.select %8, %c1_i32, %c16_i32 : i32
    %10 = vector.broadcast %9 : i32 to vector<4x256xi32>
    %11 = arith.remsi %7, %10 : vector<4x256xi32>
    %c0_i32_7 = arith.constant 0 : i32
    %12 = vector.broadcast %c0_i32_7 : i32 to vector<4x256xi32>
    %13 = arith.cmpi ne, %11, %12 : vector<4x256xi32>
    %c0_i32_8 = arith.constant 0 : i32
    %14 = vector.broadcast %c0_i32_8 : i32 to vector<4x256xi32>
    %15 = arith.cmpi slt, %11, %14 : vector<4x256xi32>
    %c0_i32_9 = arith.constant 0 : i32
    %16 = arith.cmpi slt, %9, %c0_i32_9 : i32
    %17 = vector.broadcast %16 : i1 to vector<4x256xi1>
    %18 = vector.broadcast %17 : vector<4x256xi1> to vector<4x256xi1>
    %19 = arith.xori %15, %18 : vector<4x256xi1>
    %20 = arith.andi %19, %13 : vector<4x256xi1>
    %21 = vector.broadcast %9 : i32 to vector<4x256xi32>
    %22 = arith.addi %11, %21 : vector<4x256xi32>
    %23 = arith.select %20, %22, %11 : vector<4x256xi1>, vector<4x256xi32>
    %c1_i32_10 = arith.constant 1 : i32
    %24 = vector.broadcast %c1_i32_10 : i32 to vector<4x256xi32>
    %25 = arith.cmpi sge, %23, %24 : vector<4x256xi32>
    %c15_i32 = arith.constant 15 : i32
    %26 = vector.broadcast %c15_i32 : i32 to vector<4x256xi32>
    %27 = arith.cmpi slt, %23, %26 : vector<4x256xi32>
    %c0_11 = arith.constant 0 : index
    %c111 = arith.constant 111 : index
    %28 = vector.load %arg5[%c0_11, %c111] : memref<4x512xf32, #tpu.memory_space<vmem>>, vector<4x256xf32>
    %cst_12 = arith.constant 0.000000e+00 : f32
    %29 = vector.broadcast %cst_12 : f32 to vector<4x256xf32>
    %30 = arith.select %25, %28, %29 : vector<4x256xi1>, vector<4x256xf32>
    %c0_13 = arith.constant 0 : index
    %c0_14 = arith.constant 0 : index
    %31 = vector.load %arg6[%c0_13, %c0_14] : memref<36x256xf32, #tpu.memory_space<vmem>>, vector<4x256xf32>
    tpu.vector_store %arg6[%c0_13, %c0_14], %30 {strides = array<i32>} : memref<36x256xf32, #tpu.memory_space<vmem>>, vector<4x256xf32>,
    %c0_15 = arith.constant 0 : index
    %c112 = arith.constant 112 : index
    %32 = vector.load %arg5[%c0_15, %c112] : memref<4x512xf32, #tpu.memory_space<vmem>>, vector<4x256xf32>
    %c4 = arith.constant 4 : index
    %c0_16 = arith.constant 0 : index
    %33 = vector.load %arg6[%c4, %c0_16] : memref<36x256xf32, #tpu.memory_space<vmem>>, vector<4x256xf32>
    tpu.vector_store %arg6[%c4, %c0_16], %32 {strides = array<i32>} : memref<36x256xf32, #tpu.memory_space<vmem>>, vector<4x256xf32>,
    %c0_17 = arith.constant 0 : index
    %c113 = arith.constant 113 : index
    %34 = vector.load %arg5[%c0_17, %c113] : memref<4x512xf32, #tpu.memory_space<vmem>>, vector<4x256xf32>
    %cst_18 = arith.constant 0.000000e+00 : f32
    %35 = vector.broadcast %cst_18 : f32 to vector<4x256xf32>
    %36 = arith.select %27, %34, %35 : vector<4x256xi1>, vector<4x256xf32>
    %c8 = arith.constant 8 : index
    %c0_19 = arith.constant 0 : index
    %37 = vector.load %arg6[%c8, %c0_19] : memref<36x256xf32, #tpu.memory_space<vmem>>, vector<4x256xf32>
    tpu.vector_store %arg6[%c8, %c0_19], %36 {strides = array<i32>} : memref<36x256xf32, #tpu.memory_space<vmem>>, vector<4x256xf32>,
    %c0_20 = arith.constant 0 : index
    %c127 = arith.constant 127 : index
    %38 = vector.load %arg5[%c0_20, %c127] : memref<4x512xf32, #tpu.memory_space<vmem>>, vector<4x256xf32>
    %cst_21 = arith.constant 0.000000e+00 : f32
    %39 = vector.broadcast %cst_21 : f32 to vector<4x256xf32>
    %40 = arith.select %25, %38, %39 : vector<4x256xi1>, vector<4x256xf32>
    %c12 = arith.constant 12 : index
    %c0_22 = arith.constant 0 : index
    %41 = vector.load %arg6[%c12, %c0_22] : memref<36x256xf32, #tpu.memory_space<vmem>>, vector<4x256xf32>
    tpu.vector_store %arg6[%c12, %c0_22], %40 {strides = array<i32>} : memref<36x256xf32, #tpu.memory_space<vmem>>, vector<4x256xf32>,
    %c0_23 = arith.constant 0 : index
    %c128_24 = arith.constant 128 : index
    %42 = vector.load %arg5[%c0_23, %c128_24] : memref<4x512xf32, #tpu.memory_space<vmem>>, vector<4x256xf32>
    %c16 = arith.constant 16 : index
    %c0_25 = arith.constant 0 : index
    %43 = vector.load %arg6[%c16, %c0_25] : memref<36x256xf32, #tpu.memory_space<vmem>>, vector<4x256xf32>
    tpu.vector_store %arg6[%c16, %c0_25], %42 {strides = array<i32>} : memref<36x256xf32, #tpu.memory_space<vmem>>, vector<4x256xf32>,
    %c0_26 = arith.constant 0 : index
    %c129 = arith.constant 129 : index
    %44 = vector.load %arg5[%c0_26, %c129] : memref<4x512xf32, #tpu.memory_space<vmem>>, vector<4x256xf32>
    %cst_27 = arith.constant 0.000000e+00 : f32
    %45 = vector.broadcast %cst_27 : f32 to vector<4x256xf32>
    %46 = arith.select %27, %44, %45 : vector<4x256xi1>, vector<4x256xf32>
    %c20 = arith.constant 20 : index
    %c0_28 = arith.constant 0 : index
    %47 = vector.load %arg6[%c20, %c0_28] : memref<36x256xf32, #tpu.memory_space<vmem>>, vector<4x256xf32>
    tpu.vector_store %arg6[%c20, %c0_28], %46 {strides = array<i32>} : memref<36x256xf32, #tpu.memory_space<vmem>>, vector<4x256xf32>,
    %c0_29 = arith.constant 0 : index
    %c143 = arith.constant 143 : index
    %48 = vector.load %arg5[%c0_29, %c143] : memref<4x512xf32, #tpu.memory_space<vmem>>, vector<4x256xf32>
    %cst_30 = arith.constant 0.000000e+00 : f32
    %49 = vector.broadcast %cst_30 : f32 to vector<4x256xf32>
    %50 = arith.select %25, %48, %49 : vector<4x256xi1>, vector<4x256xf32>
    %c24 = arith.constant 24 : index
    %c0_31 = arith.constant 0 : index
    %51 = vector.load %arg6[%c24, %c0_31] : memref<36x256xf32, #tpu.memory_space<vmem>>, vector<4x256xf32>
    tpu.vector_store %arg6[%c24, %c0_31], %50 {strides = array<i32>} : memref<36x256xf32, #tpu.memory_space<vmem>>, vector<4x256xf32>,
    %c0_32 = arith.constant 0 : index
    %c144 = arith.constant 144 : index
    %52 = vector.load %arg5[%c0_32, %c144] : memref<4x512xf32, #tpu.memory_space<vmem>>, vector<4x256xf32>
    %c28 = arith.constant 28 : index
    %c0_33 = arith.constant 0 : index
    %53 = vector.load %arg6[%c28, %c0_33] : memref<36x256xf32, #tpu.memory_space<vmem>>, vector<4x256xf32>
    tpu.vector_store %arg6[%c28, %c0_33], %52 {strides = array<i32>} : memref<36x256xf32, #tpu.memory_space<vmem>>, vector<4x256xf32>,
    %c0_34 = arith.constant 0 : index
    %c145 = arith.constant 145 : index
    %54 = vector.load %arg5[%c0_34, %c145] : memref<4x512xf32, #tpu.memory_space<vmem>>, vector<4x256xf32>
    %cst_35 = arith.constant 0.000000e+00 : f32
    %55 = vector.broadcast %cst_35 : f32 to vector<4x256xf32>
    %56 = arith.select %27, %54, %55 : vector<4x256xi1>, vector<4x256xf32>
    %c32 = arith.constant 32 : index
    %c0_36 = arith.constant 0 : index
    %57 = vector.load %arg6[%c32, %c0_36] : memref<36x256xf32, #tpu.memory_space<vmem>>, vector<4x256xf32>
    tpu.vector_store %arg6[%c32, %c0_36], %56 {strides = array<i32>} : memref<36x256xf32, #tpu.memory_space<vmem>>, vector<4x256xf32>,
    %c0_37 = arith.constant 0 : index
    %c0_38 = arith.constant 0 : index
    %58 = vector.load %arg2[%c0_37, %c0_38] : memref<8x36xbf16, #tpu.memory_space<vmem>>, vector<8x36xbf16>
    %c0_39 = arith.constant 0 : index
    %c0_40 = arith.constant 0 : index
    %59 = vector.load %arg6[%c0_39, %c0_40] : memref<36x256xf32, #tpu.memory_space<vmem>>, vector<36x256xf32>
    %60 = arith.truncf %59 : vector<36x256xf32> to vector<36x256xbf16>
    %cst_41 = arith.constant dense<0.000000e+00> : vector<8x256xf32>
    %61 = tpu.matmul %58, %60, %cst_41 {dimension_numbers = #tpu.dot_dimension_numbers<[1], [0], [0], [1], [0, 0, 1, 1], [], []>} : vector<8x36xbf16>, vector<36x256xbf16>, vector<8x256xf32> -> vector<8x256xf32>
    %c0_42 = arith.constant 0 : index
    %c0_43 = arith.constant 0 : index
    %62 = vector.load %arg3[%c0_42, %c0_43] : memref<8x1xf32, #tpu.memory_space<vmem>>, vector<8x1xf32>
    %63 = vector.broadcast %62 : vector<8x1xf32> to vector<8x256xf32>
    %64 = arith.addf %61, %63 : vector<8x256xf32>
    %65 = arith.negf %64 : vector<8x256xf32>
    %66 = math.exp %65 : vector<8x256xf32>
    %cst_44 = arith.constant 1.000000e+00 : f32
    %67 = vector.broadcast %cst_44 : f32 to vector<8x256xf32>
    %68 = arith.addf %67, %66 : vector<8x256xf32>
    %69 = arith.divf %67, %68 : vector<8x256xf32>
    %70 = arith.mulf %64, %69 : vector<8x256xf32>
    %c0_45 = arith.constant 0 : index
    %c0_46 = arith.constant 0 : index
    %c0_47 = arith.constant 0 : index
    %71 = vector.load %arg4[%c0_45, %c0_46, %c0_47] : memref<1x8x256xf32, #tpu.memory_space<vmem>>, vector<1x8x256xf32>
    %72 = vector.shape_cast %71 : vector<1x8x256xf32> to vector<8x256xf32>
    %73 = vector.shape_cast %70 : vector<8x256xf32> to vector<1x8x256xf32>
    tpu.vector_store %arg4[%c0_45, %c0_46, %c0_47], %73 {strides = array<i32>} : memref<1x8x256xf32, #tpu.memory_space<vmem>>, vector<1x8x256xf32>,
    return
  }
  func.func @transform_0(%arg0: i32) -> (i32, i32, i32) {
    %c0_i32 = arith.constant 0 : i32
    %c0_i32_0 = arith.constant 0 : i32
    %c0_i32_1 = arith.constant 0 : i32
    return %arg0, %c0_i32, %c0_i32_0 : i32, i32, i32
  }
  func.func @transform_1(%arg0: i32) -> (i32, i32) {
    %c0_i32 = arith.constant 0 : i32
    %c0_i32_0 = arith.constant 0 : i32
    %c0_i32_1 = arith.constant 0 : i32
    return %c0_i32, %c0_i32_0 : i32, i32
  }
  func.func @transform_2(%arg0: i32) -> (i32, i32) {
    %c0_i32 = arith.constant 0 : i32
    %c0_i32_0 = arith.constant 0 : i32
    %c0_i32_1 = arith.constant 0 : i32
    return %c0_i32, %c0_i32_0 : i32, i32
  }
  func.func @transform_3(%arg0: i32) -> (i32, i32, i32) {
    %c0_i32 = arith.constant 0 : i32
    %c0_i32_0 = arith.constant 0 : i32
    %c0_i32_1 = arith.constant 0 : i32
    return %arg0, %c0_i32, %c0_i32_0 : i32, i32, i32
  }
}

</mosaic_0001>

<bundles_post_ra>
// kernel: extra_conv_block_forward.1
= control target key start
LH: loop header
LB: loop body
LE: loop exit
PB: predicated region body
PF: predicated region fallthrough
CT: control target
= control target key end

     0   :  { %s617_s12 = smov 0   ;;  %s688_s0 = inlined_call_operand.vmem [shape: f32[2,4,256], index: 0, kind: input, shape index: {}]   ;;  %s689_s1 = inlined_call_operand.vmem [shape: bf16[8,36], index: 1, kind: input, shape index: {}]   ;;  %s690_s2 = inlined_call_operand.vmem [shape: f32[8,1], index: 2, kind: input, shape index: {}]   ;;  %s691_s3 = inlined_call_operand.vmem [shape: f32[2,8,256], index: 3, kind: output, shape index: {}]  }
   0x1 LB: > { %s529_s13 = sadd.s32 4294967295, %s585_s12   ;;  %p533_p0 = scmp.ge.s32.totalorder %s585_s12, 1  ;;  %s585_s12 = sphi %s617_s12, %s13_s12  }
   0x2   : > { %p137_p1 = scmp.lt.s32.totalorder %s585_s12, 3 }
   0x4   : > { %p138_p2 = pnand %p533_p0, %p137_p1 }
   0x5   : > { %p161_p3 = scmp.lt.s32.totalorder (!%p138_p2), %s529_s13, 1  ;;  %v587_v0 = vmov (!%p138_p2), 0.0   ;;  %s588_s18 = smov (!%p138_p2), 1   ;;  %v596_v15 = vmov (!%p138_p2), 0   ;;  %v400_v16 = vld [vmem:[%s690_s2] sm:$0xff] (!%p138_p2)  ;;  %v176_v17 = vlaneseq (!%p138_p2)  ;;  %vm218_vm0 = vcmask (!%p138_p2), 138240  }
   0x6   : > { %141 = sbr.rel (%p138_p2) target bundleno = 444 (0x1bc), region = 32  ;;  %172 = vst [vmem:[#allocation2] sm:$0xf] (!%p138_p2), %v587_v0  ;;  %173 = vst [vmem:[#allocation2 + $0xc] sm:$0xf] (!%p138_p2), %v587_v0  ;;  %s589_s19 = smov (!%p138_p2), 17   ;;  %449 = vmatprep.mubr.bf16.mxu0 (!%p138_p2), %v596_v15  ;;  %564 = vset.pattern.permute.xlu0 (!%p138_p2), %v596_v15 }
   0x7   : > { %s590_s20 = smov (!%p138_p2), 15   ;;  %s591_s21 = smov (!%p138_p2), 16   ;;  %v177_v18 = vand.u32 (!%p138_p2), 127, %v176_v17  ;;  %vm257_vm3 = vcmask (!%p138_p2), 121856   ;;  %vm277_vm5 = vcmask (!%p138_p2), 7168   ;;  %vm239_vm6 = vcmask (!%p138_p2), 130048  }
   0x8   : > { %s592_s22 = smov (!%p138_p2), 127   ;;  %s593_s23 = smov (!%p138_p2), 113   ;;  %vm309_vm8 = vcmask (!%p138_p2), 1039360   ;;  %vm335_vm9 = vcmask (!%p138_p2), 924672   ;;  %vm356_vm10 = vcmask (!%p138_p2), 916480   ;;  %vm374_vm11 = vcmask (!%p138_p2), 908288  }
   0x9   : > { %s594_s24 = smov (!%p138_p2), 112   ;;  %s595_s25 = smov (!%p138_p2), 111   ;;  %v178_v19 = vadd.s32 (!%p138_p2), 128, %v177_v18  ;;  %v183_v22 = vand.u32 (!%p138_p2), 15, %v177_v18  ;;  %vm410_vm12 = vcmask (!%p138_p2), 1041408   ;;  %vm406_vm13 = vcmask (!%p138_p2), 293888  }
   0xa   : > { %v383_v34 = vld [vmem:[%s689_s1] sm:$0xf] (!%p138_p2) }
   0xb   : > { %v190_v23 = vand.u32 (!%p138_p2), 15, %v178_v19  ;;  %vm634_vm1 = vcmp.ge.s32.totalorder (!%p138_p2), %v183_v22, 1  ;;  %vm658_vm7 = vcmp.lt.s32.totalorder (!%p138_p2), %v183_v22, 15 }
   0xd   : > { %s701_s13 = smov (!%p161_p3, %s529_s13), 1  ;;  %v299_v10 = vld [vmem:[#allocation2 + $0xc] sm:$0xf]  ;;  %vm638_vm2 = vcmp.ge.s32.totalorder %v190_v23, 1  ;;  %vm646_vm4 = vcmp.lt.s32.totalorder %v190_v23, 15 }
   0xe   : > { %s544_s14 = sshll.u32 %s701_s13, 3  ;;  %v325_v11 = vld [vmem:[#allocation2 + $0xc] sm:$0xf]  ;;  %s545_s30 = sshll.u32 %s701_s13, 4 }
   0xf   : > { %s165_s17 = scalar_lea.vmem %s688_s0, %s544_s14  ;;  %v570_v12 = vld [vmem:[#allocation2 + $0xc] ss:$0 sps:$4 sm:$0xff]   ;;  %s170_s6 = scalar_lea.vmem %s691_s3, %s545_s30 }
  0x10   : > { %v174_v1 = vld [vmem:[%s165_s17] sm:$0xff]  ;;  %v364_v14 = vld [vmem:[#allocation2 + $0xc] sm:$0xf] }
  0x11   : > { %175 = vst [vmem:[#allocation2 + $0x4] sm:$0xff] %v174_v1  ;;  %v302_v2 = vcombine.high %v174_v1, %v174_v1  ;;  %296 = vst [vmem:[#allocation3 + $0x20] sm:$0xf] %v174_v1  ;;  %v348_v13 = vcombine.low %v174_v1, %v174_v1 }
  0x13   : > { %297 = vst [vmem:[#allocation3 + $0x28] sm:$0xf] %v302_v2 }
  0x18   : > { %v267_v3 = vld [vmem:[#allocation2 + $0x8] sm:$0xf]  ;;  %v266_v4 = vld [vmem:[#allocation2] sm:$0xff] }
  0x19   : > { %275 = vrot.lane.b32.xlu0 %v267_v3, %s588_s18  ;;  %271 = vrot.lane.b32.xlu1 %v266_v4, %s588_s18  ;;  %v208_v5 = vld [vmem:[#allocation2 + $0x8] sm:$0xf]  ;;  %v270_v6 = vcombine.high %v266_v4, %v266_v4  ;;  %v231_v9 = vcombine.low %v266_v4, %v266_v4 }
  0x1a   : > { %v247_v7 = vld [vmem:[#allocation2 + $0x8] sm:$0xf] }
  0x1b   : > { %v567_v8 = vld [vmem:[#allocation2 + $0x8] ss:$0 sps:$4 sm:$0xff]  }
  0x1d   : > { %216 = vrot.lane.b32.xlu0 %v208_v5, %s589_s19  ;;  %212 = vrot.lane.b32.xlu1 %v266_v4, %s589_s19 }
  0x21   : > { %255 = vrot.lane.b32.xlu0 %v247_v7, %s590_s20  ;;  %214 = vrot.lane.b32.xlu1 %v270_v6, %s589_s19 }
  0x25   : > { %235 = vrot.lane.b32.xlu0 %v266_v4, %s591_s21  ;;  %253 = vrot.lane.b32.xlu1 %v270_v6, %s590_s20 }
  0x29   : > { %273 = vrot.lane.b32.xlu0 %v270_v6, %s588_s18  ;;  %237 = vrot.lane.b32.xlu1 %v567_v8, %s591_s21 }
  0x2d   : > { %251 = vrot.lane.b32.xlu0 %v266_v4, %s590_s20  ;;  %233 = vrot.lane.b32.xlu1 %v231_v9, %s591_s21 }
  0x31   : > { %305 = vrot.lane.b32.xlu0 %v302_v2, %s592_s22  ;;  %307 = vrot.lane.b32.xlu1 %v299_v10, %s592_s22 }
  0x35   : > { %303 = vrot.lane.b32.xlu0 %v174_v1, %s592_s22  ;;  %331 = vrot.lane.b32.xlu1 %v302_v2, %s593_s23 }
  0x39   : > { %333 = vrot.lane.b32.xlu0 %v325_v11, %s593_s23  ;;  %329 = vrot.lane.b32.xlu1 %v174_v1, %s593_s23 }
  0x3d   : > { %352 = vrot.lane.b32.xlu0 %v174_v1, %s594_s24  ;;  %354 = vrot.lane.b32.xlu1 %v570_v12, %s594_s24 }
  0x41   : > { %350 = vrot.lane.b32.xlu0 %v348_v13, %s594_s24  ;;  %368 = vrot.lane.b32.xlu1 %v174_v1, %s595_s25 }
  0x45   : > { %370 = vrot.lane.b32.xlu0 %v302_v2, %s595_s25  ;;  %372 = vrot.lane.b32.xlu1 %v364_v14, %s595_s25 }
  0x49   : > { %403 = vperm.xlu0 %564, %v400_v16  }
  0x8b   : > { %v276_v20 = vpop.permute.xlu0 %275  ;;  %v272_v21 = vpop.permute.xlu1 %271 }
  0x8f   : > { %v217_v24 = vpop.permute.xlu0 %216  ;;  %v213_v25 = vpop.permute.xlu1 %212 }
  0x93   : > { %v256_v28 = vpop.permute.xlu0 %255  ;;  %v215_v29 = vpop.permute.xlu1 %214 }
  0x94   : > { %v219_v30 = vsel %vm218_vm0, %v213_v25, %v215_v29  ;;  %v220_v31 = vsel %vm218_vm0, %v215_v29, %v217_v24 }
  0x95   : > { %v223_v32 = vsel %vm634_vm1, %v219_v30, 0.0  ;;  %v224_v33 = vsel %vm638_vm2, %v220_v31, 0.0 }
  0x96   : > { %225 = vst [vmem:[#allocation3] sm:$0xf] %v223_v32  ;;  %226 = vst [vmem:[#allocation3 + $0x8] sm:$0xf] %v224_v33 }
  0x97   : > { %v236_v35 = vpop.permute.xlu0 %235  ;;  %v254_v36 = vpop.permute.xlu1 %253 }
  0x98   : > { %v259_v37 = vsel %vm257_vm3, %v254_v36, %v256_v28 }
  0x99   : > { %v263_v38 = vsel %vm646_vm4, %v259_v37, 0.0 }
  0x9a   : > { %265 = vst [vmem:[#allocation3 + $0x18] sm:$0xf] %v263_v38 }
  0x9b   : > { %v274_v39 = vpop.permute.xlu0 %273  ;;  %v238_v40 = vpop.permute.xlu1 %237 }
  0x9c   : > { %v278_v41 = vsel %vm277_vm5, %v272_v21, %v274_v39  ;;  %v279_v42 = vsel %vm277_vm5, %v274_v39, %v276_v20  ;;  %v241_v43 = vsel %vm239_vm6, %v236_v35, %v238_v40 }
  0x9d   : > { %v282_v44 = vsel %vm634_vm1, %v278_v41, 0.0  ;;  %v283_v45 = vsel %vm638_vm2, %v279_v42, 0.0  ;;  %245 = vst [vmem:[#allocation3 + $0x8] sm:$0xf0] %v241_v43 }
  0x9e   : > { %v286_v46 = vrot.slane %v282_v44, 4  ;;  %v287_v47 = vrot.slane %v283_v45, 4 }
  0x9f   : > { %v252_v49 = vpop.permute.xlu0 %251  ;;  %v234_v50 = vpop.permute.xlu1 %233 }
  0xa0   : > { %290 = vst [vmem:[#allocation3 + $0x10] sm:$0xf0] %v286_v46  ;;  %291 = vst [vmem:[#allocation3 + $0x18] sm:$0xf0] %v287_v47  ;;  %v258_v51 = vsel %vm257_vm3, %v252_v49, %v254_v36  ;;  %v240_v52 = vsel %vm239_vm6, %v234_v50, %v236_v35 }
  0xa1   : > { %v262_v53 = vsel %vm658_vm7, %v258_v51, 0.0  ;;  %244 = vst [vmem:[#allocation3] sm:$0xf0] %v240_v52 }
  0xa2   : > { %264 = vst [vmem:[#allocation3 + $0x10] sm:$0xf] %v262_v53 }
  0xa3   : > { %v306_v54 = vpop.permute.xlu0 %305  ;;  %v308_v55 = vpop.permute.xlu1 %307 }
  0xa4   : > { %v311_v56 = vsel %vm309_vm8, %v306_v54, %v308_v55  ;;  %v385_v61 = vld [vmem:[#allocation3 + $0x8] sm:$0xff] }
  0xa5   : > { %v315_v57 = vsel %vm646_vm4, %v311_v56, 0.0 }
  0xa6   : > { %v319_v58 = vrot.slane %v315_v57, 4 }
  0xa7   : > { %v304_v59 = vpop.permute.xlu0 %303  ;;  %v332_v60 = vpop.permute.xlu1 %331  ;;  %v387_v62 = vld [vmem:[#allocation3 + $0x18] sm:$0xff] }
  0xa8   : > { %323 = vst [vmem:[#allocation3 + $0x28] sm:$0xf0] %v319_v58  ;;  %v310_v63 = vsel %vm309_vm8, %v304_v59, %v306_v54  ;;  %v395_v0 = vpack.c.bf16 %v387_v62, %v385_v61  ;;  %v384_v1 = vld [vmem:[#allocation3] sm:$0xff] }
  0xa9   : > { %v314_v2 = vsel %vm658_vm7, %v310_v63, 0.0  ;;  %v386_v3 = vld [vmem:[#allocation3 + $0x10] sm:$0xff] }
  0xaa   : > { %v318_v4 = vrot.slane %v314_v2, 4  ;;  %417 = vmatprep.subr.bf16.mxu0 %v395_v0  ;;  %v394_v5 = vpack.c.bf16 %v386_v3, %v384_v1 }
  0xab   : > { %v334_v6 = vpop.permute.xlu0 %333  ;;  %v330_v7 = vpop.permute.xlu1 %329 }
  0xac   : > { %322 = vst [vmem:[#allocation3 + $0x20] sm:$0xf0] %v318_v4  ;;  %v337_v8 = vsel %vm335_vm9, %v332_v60, %v334_v6  ;;  %v336_v9 = vsel %vm335_vm9, %v330_v7, %v332_v60  ;;  %418 = vmatpush1.bf16.msra.mxu0 %v394_v5 }
  0xad   : > { %v341_v10 = vsel %vm638_vm2, %v337_v8, 0.0  ;;  %v340_v11 = vsel %vm634_vm1, %v336_v9, 0.0 }
  0xae   : > { %343 = vst [vmem:[#allocation3 + $0x38] sm:$0xf] %v341_v10  ;;  %342 = vst [vmem:[#allocation3 + $0x30] sm:$0xf] %v340_v11 }
  0xaf   : > { %v353_v12 = vpop.permute.xlu0 %352  ;;  %v355_v13 = vpop.permute.xlu1 %354  ;;  %v389_v22 = vld [vmem:[#allocation3 + $0x28] sm:$0xff] }
  0xb0   : > { %v358_v14 = vsel %vm356_vm10, %v353_v12, %v355_v13 }
  0xb1   : > { %362 = vst [vmem:[#allocation3 + $0x38] sm:$0xf0] %v358_v14 }
  0xb3   : > { %v351_v15 = vpop.permute.xlu0 %350  ;;  %v369_v16 = vpop.permute.xlu1 %368  ;;  %v388_v27 = vld [vmem:[#allocation3 + $0x20] sm:$0xff] }
  0xb4   : > { %v357_v17 = vsel %vm356_vm10, %v351_v15, %v353_v12 }
  0xb5   : > { %361 = vst [vmem:[#allocation3 + $0x30] sm:$0xf0] %v357_v17 }
  0xb7   : > { %v371_v18 = vpop.permute.xlu0 %370  ;;  %v373_v19 = vpop.permute.xlu1 %372 }
  0xb8   : > { %v375_v20 = vsel %vm374_vm11, %v369_v16, %v371_v18  ;;  %v376_v21 = vsel %vm374_vm11, %v371_v18, %v373_v19  ;;  %v391_v23 = vld [vmem:[#allocation3 + $0x38] sm:$0xff] }
  0xb9   : > { %v379_v24 = vsel %vm658_vm7, %v375_v20, 0.0  ;;  %v380_v25 = vsel %vm646_vm4, %v376_v21, 0.0  ;;  %v397_v26 = vpack.c.bf16 %v391_v23, %v389_v22 }
  0xba   : > { %381 = vst [vmem:[#allocation3 + $0x40] sm:$0xf] %v379_v24  ;;  %382 = vst [vmem:[#allocation3 + $0x48] sm:$0xf] %v380_v25 }
  0xbb   : > { %419 = vmatprep.subr.bf16.mxu0 %v397_v26 }
  0xbc   : > { %v390_v28 = vld [vmem:[#allocation3 + $0x30] sm:$0xff] }
  0xbd   : > { %v396_v29 = vpack.c.bf16 %v390_v28, %v388_v27 }
  0xbf   : > { %420 = vmatpush1.bf16.msra.mxu0 %v396_v29 }
  0xc1   : > { %v393_v30 = vld [vmem:[#allocation3 + $0x48] sm:$0xf]  ;;  %v392_v31 = vld [vmem:[#allocation3 + $0x40] sm:$0xf] }
  0xc2   : > { %v399_v32 = vpack.c.bf16 %v393_v30, %v393_v30  ;;  %v398_v33 = vpack.c.bf16 %v392_v31, %v392_v31 }
  0xc4   : > { %538 = vmatprep.subr.msk.bf16.mxu0 %vm410_vm12, %v399_v32  ;;  %v412_v35 = vsel %vm410_vm12, %v398_v33, 0 }
  0xc5   : > { %422 = vmatpush1.bf16.msra.mxu0 %v412_v35 }
  0xc8   : > { %539 = vmatmul.mubr.msk.bf16.vlgmr.msra.gmra.mrb[0].mxu0 %vm406_vm13, %v383_v34  ;;  %v404_v36 = vpop.permute.xlu0 %403 }
 0x19b   : > { %v451_v37 = vpop.f32.mrb[0].mxu0 }
 0x19c   : > { %v452_v38 = vadd.f32 %v451_v37, %v404_v36  ;;  %v453_v39 = vpop.f32.mrb[1].mxu0 }
 0x19d   : > { %v454_v40 = vadd.f32 %v453_v39, %v404_v36  ;;  %v455_v41 = vpop.f32.mrb[2].mxu0 }
 0x19e   : > { %v540_v42 = vmul.f32 -1.442695, %v452_v38  ;;  %v456_v43 = vpop.f32.mrb[3].mxu0 }
 0x19f   : > { %v541_v44 = vmul.f32 -1.442695, %v454_v40 }
 0x1a0   : > { %571 = vpow2.f32 %v540_v42 }
 0x1a1   : > { %573 = vpow2.f32 %v541_v44 }
 0x1aa   : > { %v572_v45 = vpop.eup %571 }
 0x1ab   : > { %v574_v46 = vpop.eup %573  ;;  %v464_v47 = vadd.f32 1.0, %v572_v45 }
 0x1ac   : > { %v465_v48 = vadd.f32 1.0, %v574_v46 }
 0x1ad   : > { %575 = vrcp.f32 %v464_v47 }
 0x1ae   : > { %577 = vrcp.f32 %v465_v48 }
 0x1b7   : > { %v576_v49 = vpop.eup %575 }
 0x1b8   : > { %v578_v50 = vpop.eup %577  ;;  %v470_v51 = vmul.f32 %v576_v49, %v452_v38 }
 0x1b9   : > { %v471_v52 = vmul.f32 %v578_v50, %v454_v40 }
 0x1ba   : > { %472 = vst [vmem:[%s170_s6] sm:$0xff] %v470_v51 }
 0x1bb   : > { %473 = vst [vmem:[%s170_s6 + $0x8] sm:$0xff] %v471_v52 }
 0x1bc PF: > { %s13_s12 = sadd.s32 1, %s585_s12  }
 0x1bd   : > { %p10_p4 = scmp.ge.s32.totalorder %s13_s12, 4  }
 0x1bf   :  { %12 = sbr.rel (!%p10_p4) target bundleno = 1 (0x1), region = 62 }

</bundles_post_ra>
